<compile_context>
chip_gen: v5e
topology: v5e:2x2
jax: 0.10.0
libtpu: 0.0.40
codegen_flags: <defaults>
</compile_context>

<pallas_src>
import functools

import jax
import jax.numpy as jnp
from jax.experimental import pallas as pl
from jax.experimental.pallas import tpu as pltpu

BN_EPS = 1e-5
LANE = 128


def basic_block1d_kernel(x_ref, w1_ref, w2_ref, p_ref, o_ref, *, count):
    x = x_ref[...]            # (N, C, Mp) f32, lane-dense (Mp multiple of 128)
    w1 = w1_ref[...]          # (C, C, Mp)
    w2 = w2_ref[...]          # (C, C, Mp)
    p = p_ref[...]            # (C, 4) packed [g1, b1, g2, b2]
    cin = w1.shape[1]

    def local_conv(inp, w):
        # out[n, o, m] = sum_c inp[n, c, m] * w[o, c, m]
        # Unrolled multiply-accumulate over Cin: pure VPU work, no XLU
        # sublane reduce, no (N, Cout, Cin, Mp) intermediate.
        acc = inp[:, None, 0, :] * w[None, :, 0, :]
        for c in range(1, cin):
            acc = acc + inp[:, None, c, :] * w[None, :, c, :]
        return acc                                   # (N, Cout, Mp)

    def batch_norm(t, gamma, beta):
        # Training-mode BatchNorm1d, single pass, affine fused into one
        # scale/shift.  Padded lanes of t are exactly zero, so plain sums
        # divided by the true element count give the unpadded statistics.
        inv_n = 1.0 / count
        mean = jnp.sum(t, axis=(0, 2), keepdims=True) * inv_n       # (1,C,1)
        ex2 = jnp.sum(t * t, axis=(0, 2), keepdims=True) * inv_n    # (1,C,1)
        var = ex2 - mean * mean
        scale = gamma * jax.lax.rsqrt(var + BN_EPS)                 # EUP rsqrt
        shift = beta - mean * scale
        return t * scale + shift

    # (1, C, 1) parameter views; C stays on the sublane axis, matching (N,C,Mp).
    g1 = p[:, 0:1][None, :, :]
    b1 = p[:, 1:2][None, :, :]
    g2 = p[:, 2:3][None, :, :]
    b2 = p[:, 3:4][None, :, :]

    out = local_conv(x, w1)                           # conv1
    out = jnp.maximum(batch_norm(out, g1, b1), 0.0)   # bn1 + relu
    out = local_conv(out, w2)                         # conv2
    out = batch_norm(out, g2, b2) + x                 # bn2 + residual
    o_ref[...] = jnp.maximum(out, 0.0)                # relu, lane-dense store


@jax.jit
def basic_block1d(x, w1, g1, b1, w2, g2, b2):
    n, c, m = x.shape
    mp = ((m + LANE - 1) // LANE) * LANE
    pad = ((0, 0), (0, 0), (0, mp - m))
    xp = jnp.pad(x, pad)            # zero padding keeps BN sums exact
    w1p = jnp.pad(w1, pad)
    w2p = jnp.pad(w2, pad)
    params = jnp.concatenate([g1, b1, g2, b2], axis=1)   # (C, 4)

    vmem = pl.BlockSpec(memory_space=pltpu.MemorySpace.VMEM)
    out = pl.pallas_call(
        functools.partial(basic_block1d_kernel, count=float(n * m)),
        out_shape=jax.ShapeDtypeStruct((n, c, mp), x.dtype),
        in_specs=[vmem] * 4,
        out_specs=vmem,
        input_output_aliases={0: 0},   # output reuses the padded-x HBM buffer
    )(xp, w1p, w2p, params)
    return out[..., :m]


def basic_block1d_ref(x, w1, g1, b1, w2, g2, b2):
    # Pure-JAX reference (independent formulation) for correctness checking.
    def lc(inp, w):
        return jnp.einsum('ncm,ocm->nom', inp, w)

    def bn(t, g, b):
        mean = t.mean(axis=(0, 2), keepdims=True)
        var = ((t - mean) ** 2).mean(axis=(0, 2), keepdims=True)
        return (t - mean) / jnp.sqrt(var + BN_EPS) * g[None] + b[None]

    out = jax.nn.relu(bn(lc(x, w1), g1, b1))
    out = bn(lc(out, w2), g2, b2) + x
    return jax.nn.relu(out)


if __name__ == "__main__":
    # Small shapes consistent with the module:
    # inplanes == planes (residual add, downsample=None), mask_channel = M.
    N, C, M = 2, 8, 24   # batch, channels (inplanes = planes), mask_channel

    key = jax.random.PRNGKey(0)
    kx, kw1, kw2, kg1, kb1, kg2, kb2 = jax.random.split(key, 7)

    x = jax.random.normal(kx, (N, C, M), dtype=jnp.float32)

    # LocallyConnected2d weights: torch.randn(1, out, in, M, 1, 1) -> (out, in, M)
    w1 = jax.random.normal(kw1, (C, C, M), dtype=jnp.float32)
    w2 = jax.random.normal(kw2, (C, C, M), dtype=jnp.float32)

    # BatchNorm1d affine params (torch init is gamma=1, beta=0; perturb a bit
    # deterministically so the affine path is actually exercised).
    g1 = 1.0 + 0.1 * jax.random.normal(kg1, (C, 1), dtype=jnp.float32)
    b1 = 0.1 * jax.random.normal(kb1, (C, 1), dtype=jnp.float32)
    g2 = 1.0 + 0.1 * jax.random.normal(kg2, (C, 1), dtype=jnp.float32)
    b2 = 0.1 * jax.random.normal(kb2, (C, 1), dtype=jnp.float32)

    out = basic_block1d(x, w1, g1, b1, w2, g2, b2)
    out = jax.block_until_ready(out)

    ref = basic_block1d_ref(x, w1, g1, b1, w2, g2, b2)
    ref = jax.block_until_ready(ref)

    assert out.shape == (N, C, M), out.shape
    assert jnp.allclose(out, ref, atol=1e-4, rtol=1e-4), (
        float(jnp.max(jnp.abs(out - ref))))

    print("KERNEL_OK")
</pallas_src>

<mosaic_0001>
module attributes {stable_mosaic.version = 11 : i64} {
  func.func @basic_block1d_kernel(%arg0: memref<2x8x128xf32, #tpu.memory_space<vmem>>, %arg1: memref<8x8x128xf32, #tpu.memory_space<vmem>>, %arg2: memref<8x8x128xf32, #tpu.memory_space<vmem>>, %arg3: memref<8x4xf32, #tpu.memory_space<vmem>>, %arg4: memref<2x8x128xf32, #tpu.memory_space<vmem>>) attributes {dimension_semantics = [], scalar_prefetch = 0 : i64, scratch_operands = 0 : i64, tpu.core_type = #tpu.core_type<tc>} {
    %c0 = arith.constant 0 : index
    %c0_0 = arith.constant 0 : index
    %c0_1 = arith.constant 0 : index
    %0 = vector.load %arg0[%c0, %c0_0, %c0_1] : memref<2x8x128xf32, #tpu.memory_space<vmem>>, vector<2x8x128xf32>
    %c0_2 = arith.constant 0 : index
    %c0_3 = arith.constant 0 : index
    %c0_4 = arith.constant 0 : index
    %1 = vector.load %arg1[%c0_2, %c0_3, %c0_4] : memref<8x8x128xf32, #tpu.memory_space<vmem>>, vector<8x8x128xf32>
    %c0_5 = arith.constant 0 : index
    %c0_6 = arith.constant 0 : index
    %c0_7 = arith.constant 0 : index
    %2 = vector.load %arg2[%c0_5, %c0_6, %c0_7] : memref<8x8x128xf32, #tpu.memory_space<vmem>>, vector<8x8x128xf32>
    %c0_8 = arith.constant 0 : index
    %c0_9 = arith.constant 0 : index
    %3 = vector.load %arg3[%c0_8, %c0_9] : memref<8x4xf32, #tpu.memory_space<vmem>>, vector<8x4xf32>
    %4 = vector.extract_strided_slice %3 {offsets = [0, 0], sizes = [8, 1], strides = [1, 1]} : vector<8x4xf32> to vector<8x1xf32>
    %5 = vector.shape_cast %4 : vector<8x1xf32> to vector<1x8x1xf32>
    %6 = vector.extract_strided_slice %3 {offsets = [0, 1], sizes = [8, 1], strides = [1, 1]} : vector<8x4xf32> to vector<8x1xf32>
    %7 = vector.shape_cast %6 : vector<8x1xf32> to vector<1x8x1xf32>
    %8 = vector.extract_strided_slice %3 {offsets = [0, 2], sizes = [8, 1], strides = [1, 1]} : vector<8x4xf32> to vector<8x1xf32>
    %9 = vector.shape_cast %8 : vector<8x1xf32> to vector<1x8x1xf32>
    %10 = vector.extract_strided_slice %3 {offsets = [0, 3], sizes = [8, 1], strides = [1, 1]} : vector<8x4xf32> to vector<8x1xf32>
    %11 = vector.shape_cast %10 : vector<8x1xf32> to vector<1x8x1xf32>
    %12 = vector.extract_strided_slice %0 {offsets = [0, 0, 0], sizes = [2, 1, 128], strides = [1, 1, 1]} : vector<2x8x128xf32> to vector<2x1x128xf32>
    %13 = vector.shape_cast %12 : vector<2x1x128xf32> to vector<2x128xf32>
    %14 = vector.shape_cast %13 : vector<2x128xf32> to vector<2x1x128xf32>
    %15 = vector.extract_strided_slice %1 {offsets = [0, 0, 0], sizes = [8, 1, 128], strides = [1, 1, 1]} : vector<8x8x128xf32> to vector<8x1x128xf32>
    %16 = vector.shape_cast %15 : vector<8x1x128xf32> to vector<8x128xf32>
    %17 = vector.shape_cast %16 : vector<8x128xf32> to vector<1x8x128xf32>
    %18 = vector.broadcast %14 : vector<2x1x128xf32> to vector<2x8x128xf32>
    %19 = vector.broadcast %17 : vector<1x8x128xf32> to vector<2x8x128xf32>
    %20 = arith.mulf %18, %19 : vector<2x8x128xf32>
    %21 = vector.extract_strided_slice %0 {offsets = [0, 1, 0], sizes = [2, 1, 128], strides = [1, 1, 1]} : vector<2x8x128xf32> to vector<2x1x128xf32>
    %22 = vector.shape_cast %21 : vector<2x1x128xf32> to vector<2x128xf32>
    %23 = vector.shape_cast %22 : vector<2x128xf32> to vector<2x1x128xf32>
    %24 = vector.extract_strided_slice %1 {offsets = [0, 1, 0], sizes = [8, 1, 128], strides = [1, 1, 1]} : vector<8x8x128xf32> to vector<8x1x128xf32>
    %25 = vector.shape_cast %24 : vector<8x1x128xf32> to vector<8x128xf32>
    %26 = vector.shape_cast %25 : vector<8x128xf32> to vector<1x8x128xf32>
    %27 = vector.broadcast %23 : vector<2x1x128xf32> to vector<2x8x128xf32>
    %28 = vector.broadcast %26 : vector<1x8x128xf32> to vector<2x8x128xf32>
    %29 = arith.mulf %27, %28 : vector<2x8x128xf32>
    %30 = arith.addf %20, %29 : vector<2x8x128xf32>
    %31 = vector.extract_strided_slice %0 {offsets = [0, 2, 0], sizes = [2, 1, 128], strides = [1, 1, 1]} : vector<2x8x128xf32> to vector<2x1x128xf32>
    %32 = vector.shape_cast %31 : vector<2x1x128xf32> to vector<2x128xf32>
    %33 = vector.shape_cast %32 : vector<2x128xf32> to vector<2x1x128xf32>
    %34 = vector.extract_strided_slice %1 {offsets = [0, 2, 0], sizes = [8, 1, 128], strides = [1, 1, 1]} : vector<8x8x128xf32> to vector<8x1x128xf32>
    %35 = vector.shape_cast %34 : vector<8x1x128xf32> to vector<8x128xf32>
    %36 = vector.shape_cast %35 : vector<8x128xf32> to vector<1x8x128xf32>
    %37 = vector.broadcast %33 : vector<2x1x128xf32> to vector<2x8x128xf32>
    %38 = vector.broadcast %36 : vector<1x8x128xf32> to vector<2x8x128xf32>
    %39 = arith.mulf %37, %38 : vector<2x8x128xf32>
    %40 = arith.addf %30, %39 : vector<2x8x128xf32>
    %41 = vector.extract_strided_slice %0 {offsets = [0, 3, 0], sizes = [2, 1, 128], strides = [1, 1, 1]} : vector<2x8x128xf32> to vector<2x1x128xf32>
    %42 = vector.shape_cast %41 : vector<2x1x128xf32> to vector<2x128xf32>
    %43 = vector.shape_cast %42 : vector<2x128xf32> to vector<2x1x128xf32>
    %44 = vector.extract_strided_slice %1 {offsets = [0, 3, 0], sizes = [8, 1, 128], strides = [1, 1, 1]} : vector<8x8x128xf32> to vector<8x1x128xf32>
    %45 = vector.shape_cast %44 : vector<8x1x128xf32> to vector<8x128xf32>
    %46 = vector.shape_cast %45 : vector<8x128xf32> to vector<1x8x128xf32>
    %47 = vector.broadcast %43 : vector<2x1x128xf32> to vector<2x8x128xf32>
    %48 = vector.broadcast %46 : vector<1x8x128xf32> to vector<2x8x128xf32>
    %49 = arith.mulf %47, %48 : vector<2x8x128xf32>
    %50 = arith.addf %40, %49 : vector<2x8x128xf32>
    %51 = vector.extract_strided_slice %0 {offsets = [0, 4, 0], sizes = [2, 1, 128], strides = [1, 1, 1]} : vector<2x8x128xf32> to vector<2x1x128xf32>
    %52 = vector.shape_cast %51 : vector<2x1x128xf32> to vector<2x128xf32>
    %53 = vector.shape_cast %52 : vector<2x128xf32> to vector<2x1x128xf32>
    %54 = vector.extract_strided_slice %1 {offsets = [0, 4, 0], sizes = [8, 1, 128], strides = [1, 1, 1]} : vector<8x8x128xf32> to vector<8x1x128xf32>
    %55 = vector.shape_cast %54 : vector<8x1x128xf32> to vector<8x128xf32>
    %56 = vector.shape_cast %55 : vector<8x128xf32> to vector<1x8x128xf32>
    %57 = vector.broadcast %53 : vector<2x1x128xf32> to vector<2x8x128xf32>
    %58 = vector.broadcast %56 : vector<1x8x128xf32> to vector<2x8x128xf32>
    %59 = arith.mulf %57, %58 : vector<2x8x128xf32>
    %60 = arith.addf %50, %59 : vector<2x8x128xf32>
    %61 = vector.extract_strided_slice %0 {offsets = [0, 5, 0], sizes = [2, 1, 128], strides = [1, 1, 1]} : vector<2x8x128xf32> to vector<2x1x128xf32>
    %62 = vector.shape_cast %61 : vector<2x1x128xf32> to vector<2x128xf32>
    %63 = vector.shape_cast %62 : vector<2x128xf32> to vector<2x1x128xf32>
    %64 = vector.extract_strided_slice %1 {offsets = [0, 5, 0], sizes = [8, 1, 128], strides = [1, 1, 1]} : vector<8x8x128xf32> to vector<8x1x128xf32>
    %65 = vector.shape_cast %64 : vector<8x1x128xf32> to vector<8x128xf32>
    %66 = vector.shape_cast %65 : vector<8x128xf32> to vector<1x8x128xf32>
    %67 = vector.broadcast %63 : vector<2x1x128xf32> to vector<2x8x128xf32>
    %68 = vector.broadcast %66 : vector<1x8x128xf32> to vector<2x8x128xf32>
    %69 = arith.mulf %67, %68 : vector<2x8x128xf32>
    %70 = arith.addf %60, %69 : vector<2x8x128xf32>
    %71 = vector.extract_strided_slice %0 {offsets = [0, 6, 0], sizes = [2, 1, 128], strides = [1, 1, 1]} : vector<2x8x128xf32> to vector<2x1x128xf32>
    %72 = vector.shape_cast %71 : vector<2x1x128xf32> to vector<2x128xf32>
    %73 = vector.shape_cast %72 : vector<2x128xf32> to vector<2x1x128xf32>
    %74 = vector.extract_strided_slice %1 {offsets = [0, 6, 0], sizes = [8, 1, 128], strides = [1, 1, 1]} : vector<8x8x128xf32> to vector<8x1x128xf32>
    %75 = vector.shape_cast %74 : vector<8x1x128xf32> to vector<8x128xf32>
    %76 = vector.shape_cast %75 : vector<8x128xf32> to vector<1x8x128xf32>
    %77 = vector.broadcast %73 : vector<2x1x128xf32> to vector<2x8x128xf32>
    %78 = vector.broadcast %76 : vector<1x8x128xf32> to vector<2x8x128xf32>
    %79 = arith.mulf %77, %78 : vector<2x8x128xf32>
    %80 = arith.addf %70, %79 : vector<2x8x128xf32>
    %81 = vector.extract_strided_slice %0 {offsets = [0, 7, 0], sizes = [2, 1, 128], strides = [1, 1, 1]} : vector<2x8x128xf32> to vector<2x1x128xf32>
    %82 = vector.shape_cast %81 : vector<2x1x128xf32> to vector<2x128xf32>
    %83 = vector.shape_cast %82 : vector<2x128xf32> to vector<2x1x128xf32>
    %84 = vector.extract_strided_slice %1 {offsets = [0, 7, 0], sizes = [8, 1, 128], strides = [1, 1, 1]} : vector<8x8x128xf32> to vector<8x1x128xf32>
    %85 = vector.shape_cast %84 : vector<8x1x128xf32> to vector<8x128xf32>
    %86 = vector.shape_cast %85 : vector<8x128xf32> to vector<1x8x128xf32>
    %87 = vector.broadcast %83 : vector<2x1x128xf32> to vector<2x8x128xf32>
    %88 = vector.broadcast %86 : vector<1x8x128xf32> to vector<2x8x128xf32>
    %89 = arith.mulf %87, %88 : vector<2x8x128xf32>
    %90 = arith.addf %80, %89 : vector<2x8x128xf32>
    %cst = arith.constant dense<0.000000e+00> : vector<8xf32>
    %91 = vector.multi_reduction <add>, %90, %cst [0, 2] : vector<2x8x128xf32> to vector<8xf32>
    %92 = vector.shape_cast %91 : vector<8xf32> to vector<1x8x1xf32>
    %cst_10 = arith.constant 0.020833334 : f32
    %93 = vector.broadcast %cst_10 : f32 to vector<1x8x1xf32>
    %94 = arith.mulf %92, %93 : vector<1x8x1xf32>
    %95 = arith.mulf %90, %90 : vector<2x8x128xf32>
    %cst_11 = arith.constant dense<0.000000e+00> : vector<8xf32>
    %96 = vector.multi_reduction <add>, %95, %cst_11 [0, 2] : vector<2x8x128xf32> to vector<8xf32>
    %97 = vector.shape_cast %96 : vector<8xf32> to vector<1x8x1xf32>
    %cst_12 = arith.constant 0.020833334 : f32
    %98 = vector.broadcast %cst_12 : f32 to vector<1x8x1xf32>
    %99 = arith.mulf %97, %98 : vector<1x8x1xf32>
    %100 = arith.mulf %94, %94 : vector<1x8x1xf32>
    %101 = arith.subf %99, %100 : vector<1x8x1xf32>
    %cst_13 = arith.constant 9.99999974E-6 : f32
    %102 = vector.broadcast %cst_13 : f32 to vector<1x8x1xf32>
    %103 = arith.addf %101, %102 : vector<1x8x1xf32>
    %104 = math.rsqrt %103 : vector<1x8x1xf32>
    %105 = arith.mulf %5, %104 : vector<1x8x1xf32>
    %106 = arith.mulf %94, %105 : vector<1x8x1xf32>
    %107 = arith.subf %7, %106 : vector<1x8x1xf32>
    %108 = vector.broadcast %105 : vector<1x8x1xf32> to vector<2x8x128xf32>
    %109 = arith.mulf %90, %108 : vector<2x8x128xf32>
    %110 = vector.broadcast %107 : vector<1x8x1xf32> to vector<2x8x128xf32>
    %111 = arith.addf %109, %110 : vector<2x8x128xf32>
    %cst_14 = arith.constant 0.000000e+00 : f32
    %112 = vector.broadcast %cst_14 : f32 to vector<2x8x128xf32>
    %113 = arith.maximumf %111, %112 : vector<2x8x128xf32>
    %114 = vector.extract_strided_slice %113 {offsets = [0, 0, 0], sizes = [2, 1, 128], strides = [1, 1, 1]} : vector<2x8x128xf32> to vector<2x1x128xf32>
    %115 = vector.shape_cast %114 : vector<2x1x128xf32> to vector<2x128xf32>
    %116 = vector.shape_cast %115 : vector<2x128xf32> to vector<2x1x128xf32>
    %117 = vector.extract_strided_slice %2 {offsets = [0, 0, 0], sizes = [8, 1, 128], strides = [1, 1, 1]} : vector<8x8x128xf32> to vector<8x1x128xf32>
    %118 = vector.shape_cast %117 : vector<8x1x128xf32> to vector<8x128xf32>
    %119 = vector.shape_cast %118 : vector<8x128xf32> to vector<1x8x128xf32>
    %120 = vector.broadcast %116 : vector<2x1x128xf32> to vector<2x8x128xf32>
    %121 = vector.broadcast %119 : vector<1x8x128xf32> to vector<2x8x128xf32>
    %122 = arith.mulf %120, %121 : vector<2x8x128xf32>
    %123 = vector.extract_strided_slice %113 {offsets = [0, 1, 0], sizes = [2, 1, 128], strides = [1, 1, 1]} : vector<2x8x128xf32> to vector<2x1x128xf32>
    %124 = vector.shape_cast %123 : vector<2x1x128xf32> to vector<2x128xf32>
    %125 = vector.shape_cast %124 : vector<2x128xf32> to vector<2x1x128xf32>
    %126 = vector.extract_strided_slice %2 {offsets = [0, 1, 0], sizes = [8, 1, 128], strides = [1, 1, 1]} : vector<8x8x128xf32> to vector<8x1x128xf32>
    %127 = vector.shape_cast %126 : vector<8x1x128xf32> to vector<8x128xf32>
    %128 = vector.shape_cast %127 : vector<8x128xf32> to vector<1x8x128xf32>
    %129 = vector.broadcast %125 : vector<2x1x128xf32> to vector<2x8x128xf32>
    %130 = vector.broadcast %128 : vector<1x8x128xf32> to vector<2x8x128xf32>
    %131 = arith.mulf %129, %130 : vector<2x8x128xf32>
    %132 = arith.addf %122, %131 : vector<2x8x128xf32>
    %133 = vector.extract_strided_slice %113 {offsets = [0, 2, 0], sizes = [2, 1, 128], strides = [1, 1, 1]} : vector<2x8x128xf32> to vector<2x1x128xf32>
    %134 = vector.shape_cast %133 : vector<2x1x128xf32> to vector<2x128xf32>
    %135 = vector.shape_cast %134 : vector<2x128xf32> to vector<2x1x128xf32>
    %136 = vector.extract_strided_slice %2 {offsets = [0, 2, 0], sizes = [8, 1, 128], strides = [1, 1, 1]} : vector<8x8x128xf32> to vector<8x1x128xf32>
    %137 = vector.shape_cast %136 : vector<8x1x128xf32> to vector<8x128xf32>
    %138 = vector.shape_cast %137 : vector<8x128xf32> to vector<1x8x128xf32>
    %139 = vector.broadcast %135 : vector<2x1x128xf32> to vector<2x8x128xf32>
    %140 = vector.broadcast %138 : vector<1x8x128xf32> to vector<2x8x128xf32>
    %141 = arith.mulf %139, %140 : vector<2x8x128xf32>
    %142 = arith.addf %132, %141 : vector<2x8x128xf32>
    %143 = vector.extract_strided_slice %113 {offsets = [0, 3, 0], sizes = [2, 1, 128], strides = [1, 1, 1]} : vector<2x8x128xf32> to vector<2x1x128xf32>
    %144 = vector.shape_cast %143 : vector<2x1x128xf32> to vector<2x128xf32>
    %145 = vector.shape_cast %144 : vector<2x128xf32> to vector<2x1x128xf32>
    %146 = vector.extract_strided_slice %2 {offsets = [0, 3, 0], sizes = [8, 1, 128], strides = [1, 1, 1]} : vector<8x8x128xf32> to vector<8x1x128xf32>
    %147 = vector.shape_cast %146 : vector<8x1x128xf32> to vector<8x128xf32>
    %148 = vector.shape_cast %147 : vector<8x128xf32> to vector<1x8x128xf32>
    %149 = vector.broadcast %145 : vector<2x1x128xf32> to vector<2x8x128xf32>
    %150 = vector.broadcast %148 : vector<1x8x128xf32> to vector<2x8x128xf32>
    %151 = arith.mulf %149, %150 : vector<2x8x128xf32>
    %152 = arith.addf %142, %151 : vector<2x8x128xf32>
    %153 = vector.extract_strided_slice %113 {offsets = [0, 4, 0], sizes = [2, 1, 128], strides = [1, 1, 1]} : vector<2x8x128xf32> to vector<2x1x128xf32>
    %154 = vector.shape_cast %153 : vector<2x1x128xf32> to vector<2x128xf32>
    %155 = vector.shape_cast %154 : vector<2x128xf32> to vector<2x1x128xf32>
    %156 = vector.extract_strided_slice %2 {offsets = [0, 4, 0], sizes = [8, 1, 128], strides = [1, 1, 1]} : vector<8x8x128xf32> to vector<8x1x128xf32>
    %157 = vector.shape_cast %156 : vector<8x1x128xf32> to vector<8x128xf32>
    %158 = vector.shape_cast %157 : vector<8x128xf32> to vector<1x8x128xf32>
    %159 = vector.broadcast %155 : vector<2x1x128xf32> to vector<2x8x128xf32>
    %160 = vector.broadcast %158 : vector<1x8x128xf32> to vector<2x8x128xf32>
    %161 = arith.mulf %159, %160 : vector<2x8x128xf32>
    %162 = arith.addf %152, %161 : vector<2x8x128xf32>
    %163 = vector.extract_strided_slice %113 {offsets = [0, 5, 0], sizes = [2, 1, 128], strides = [1, 1, 1]} : vector<2x8x128xf32> to vector<2x1x128xf32>
    %164 = vector.shape_cast %163 : vector<2x1x128xf32> to vector<2x128xf32>
    %165 = vector.shape_cast %164 : vector<2x128xf32> to vector<2x1x128xf32>
    %166 = vector.extract_strided_slice %2 {offsets = [0, 5, 0], sizes = [8, 1, 128], strides = [1, 1, 1]} : vector<8x8x128xf32> to vector<8x1x128xf32>
    %167 = vector.shape_cast %166 : vector<8x1x128xf32> to vector<8x128xf32>
    %168 = vector.shape_cast %167 : vector<8x128xf32> to vector<1x8x128xf32>
    %169 = vector.broadcast %165 : vector<2x1x128xf32> to vector<2x8x128xf32>
    %170 = vector.broadcast %168 : vector<1x8x128xf32> to vector<2x8x128xf32>
    %171 = arith.mulf %169, %170 : vector<2x8x128xf32>
    %172 = arith.addf %162, %171 : vector<2x8x128xf32>
    %173 = vector.extract_strided_slice %113 {offsets = [0, 6, 0], sizes = [2, 1, 128], strides = [1, 1, 1]} : vector<2x8x128xf32> to vector<2x1x128xf32>
    %174 = vector.shape_cast %173 : vector<2x1x128xf32> to vector<2x128xf32>
    %175 = vector.shape_cast %174 : vector<2x128xf32> to vector<2x1x128xf32>
    %176 = vector.extract_strided_slice %2 {offsets = [0, 6, 0], sizes = [8, 1, 128], strides = [1, 1, 1]} : vector<8x8x128xf32> to vector<8x1x128xf32>
    %177 = vector.shape_cast %176 : vector<8x1x128xf32> to vector<8x128xf32>
    %178 = vector.shape_cast %177 : vector<8x128xf32> to vector<1x8x128xf32>
    %179 = vector.broadcast %175 : vector<2x1x128xf32> to vector<2x8x128xf32>
    %180 = vector.broadcast %178 : vector<1x8x128xf32> to vector<2x8x128xf32>
    %181 = arith.mulf %179, %180 : vector<2x8x128xf32>
    %182 = arith.addf %172, %181 : vector<2x8x128xf32>
    %183 = vector.extract_strided_slice %113 {offsets = [0, 7, 0], sizes = [2, 1, 128], strides = [1, 1, 1]} : vector<2x8x128xf32> to vector<2x1x128xf32>
    %184 = vector.shape_cast %183 : vector<2x1x128xf32> to vector<2x128xf32>
    %185 = vector.shape_cast %184 : vector<2x128xf32> to vector<2x1x128xf32>
    %186 = vector.extract_strided_slice %2 {offsets = [0, 7, 0], sizes = [8, 1, 128], strides = [1, 1, 1]} : vector<8x8x128xf32> to vector<8x1x128xf32>
    %187 = vector.shape_cast %186 : vector<8x1x128xf32> to vector<8x128xf32>
    %188 = vector.shape_cast %187 : vector<8x128xf32> to vector<1x8x128xf32>
    %189 = vector.broadcast %185 : vector<2x1x128xf32> to vector<2x8x128xf32>
    %190 = vector.broadcast %188 : vector<1x8x128xf32> to vector<2x8x128xf32>
    %191 = arith.mulf %189, %190 : vector<2x8x128xf32>
    %192 = arith.addf %182, %191 : vector<2x8x128xf32>
    %cst_15 = arith.constant dense<0.000000e+00> : vector<8xf32>
    %193 = vector.multi_reduction <add>, %192, %cst_15 [0, 2] : vector<2x8x128xf32> to vector<8xf32>
    %194 = vector.shape_cast %193 : vector<8xf32> to vector<1x8x1xf32>
    %cst_16 = arith.constant 0.020833334 : f32
    %195 = vector.broadcast %cst_16 : f32 to vector<1x8x1xf32>
    %196 = arith.mulf %194, %195 : vector<1x8x1xf32>
    %197 = arith.mulf %192, %192 : vector<2x8x128xf32>
    %cst_17 = arith.constant dense<0.000000e+00> : vector<8xf32>
    %198 = vector.multi_reduction <add>, %197, %cst_17 [0, 2] : vector<2x8x128xf32> to vector<8xf32>
    %199 = vector.shape_cast %198 : vector<8xf32> to vector<1x8x1xf32>
    %cst_18 = arith.constant 0.020833334 : f32
    %200 = vector.broadcast %cst_18 : f32 to vector<1x8x1xf32>
    %201 = arith.mulf %199, %200 : vector<1x8x1xf32>
    %202 = arith.mulf %196, %196 : vector<1x8x1xf32>
    %203 = arith.subf %201, %202 : vector<1x8x1xf32>
    %cst_19 = arith.constant 9.99999974E-6 : f32
    %204 = vector.broadcast %cst_19 : f32 to vector<1x8x1xf32>
    %205 = arith.addf %203, %204 : vector<1x8x1xf32>
    %206 = math.rsqrt %205 : vector<1x8x1xf32>
    %207 = arith.mulf %9, %206 : vector<1x8x1xf32>
    %208 = arith.mulf %196, %207 : vector<1x8x1xf32>
    %209 = arith.subf %11, %208 : vector<1x8x1xf32>
    %210 = vector.broadcast %207 : vector<1x8x1xf32> to vector<2x8x128xf32>
    %211 = arith.mulf %192, %210 : vector<2x8x128xf32>
    %212 = vector.broadcast %209 : vector<1x8x1xf32> to vector<2x8x128xf32>
    %213 = arith.addf %211, %212 : vector<2x8x128xf32>
    %214 = arith.addf %213, %0 : vector<2x8x128xf32>
    %cst_20 = arith.constant 0.000000e+00 : f32
    %215 = vector.broadcast %cst_20 : f32 to vector<2x8x128xf32>
    %216 = arith.maximumf %214, %215 : vector<2x8x128xf32>
    %c0_21 = arith.constant 0 : index
    %c0_22 = arith.constant 0 : index
    %c0_23 = arith.constant 0 : index
    %217 = vector.load %arg4[%c0_21, %c0_22, %c0_23] : memref<2x8x128xf32, #tpu.memory_space<vmem>>, vector<2x8x128xf32>
    tpu.vector_store %arg4[%c0_21, %c0_22, %c0_23], %216 {strides = array<i32>} : memref<2x8x128xf32, #tpu.memory_space<vmem>>, vector<2x8x128xf32>,
    return
  }
}

</mosaic_0001>

<bundles_post_ra>
// kernel: basic_block1d.1
= control target key start
LH: loop header
LB: loop body
LE: loop exit
PB: predicated region body
PF: predicated region fallthrough
CT: control target
= control target key end

     0   :  { %vm47_vm0 = vcmask 1041409   ;;  %vm50_vm1 = vcmask 1042434   ;;  %vm53_vm2 = vcmask 1043459   ;;  %vm56_vm3 = vcmask 1044484   ;;  %s506_s9 = smov 1   ;;  %s918_s0 = inlined_call_operand.vmem [shape: f32[2,8,128], index: 0, kind: input, shape index: {}, may-alias: {0,4}]   ;;  %s919_s1 = inlined_call_operand.vmem [shape: f32[8,8,128], index: 1, kind: input, shape index: {}]   ;;  %s920_s3 = inlined_call_operand.vmem [shape: f32[8,4], index: 3, kind: input, shape index: {}]   ;;  %s921_s2 = inlined_call_operand.vmem [shape: f32[8,8,128], index: 2, kind: input, shape index: {}]   ;;  %s922_s4 = inlined_call_operand.vmem [shape: f32[2,8,128], index: 4, kind: output, shape index: {}, may-alias: {0,4}]  }
   0x1   :  { %v538_v0 = vld [vmem:[%s918_s0] sm:$0xff]  ;;  %v543_v1 = vld [vmem:[%s918_s0 + $0x8] sm:$0xff]  ;;  %vm59_vm4 = vcmask 1045509   ;;  %vm62_vm5 = vcmask 1046534   ;;  %v558_v4 = vld [vmem:[%s919_s1 + $0x10] sm:$0xff]  ;;  %vm65_vm6 = vcmask 1047559  }
   0x2   :  { %v548_v2 = vld [vmem:[%s919_s1] sm:$0xff]  ;;  %v553_v3 = vld [vmem:[%s919_s1 + $0x8] sm:$0xff]  ;;  %v563_v5 = vld [vmem:[%s919_s1 + $0x18] sm:$0xff]  ;;  %v36_v6 = vperm.slane %v538_v0, 0  ;;  %v37_v7 = vperm.slane %v543_v1, 0  ;;  %v49_v12 = vrot.slane %v558_v4, 6 }
   0x3   :  { %v570_v8 = vld [vmem:[%s919_s1 + $0x20] sm:$0xff]  ;;  %v575_v9 = vld [vmem:[%s919_s1 + $0x28] sm:$0xff]  ;;  %v580_v10 = vld [vmem:[%s919_s1 + $0x30] sm:$0xff]  ;;  %v46_v11 = vrot.slane %v553_v3, 7  ;;  %v52_v13 = vrot.slane %v563_v5, 5  ;;  %v70_v18 = vperm.slane %v538_v0, 1 }
   0x4   :  { %v588_v14 = vld [vmem:[%s919_s1 + $0x38] sm:$0xff]  ;;  %v55_v15 = vrot.slane %v570_v8, 4  ;;  %v58_v16 = vrot.slane %v575_v9, 3  ;;  %v61_v17 = vrot.slane %v580_v10, 2  ;;  %v71_v20 = vperm.slane %v543_v1, 1 }
   0x5   :  { %v48_v19 = vsel %vm47_vm0, %v46_v11, %v548_v2  ;;  %v72_v21 = vrot.slane %v548_v2, 1  ;;  %v74_v22 = vrot.slane %v558_v4, 7  ;;  %v64_v24 = vrot.slane %v588_v14, 1 }
   0x6   :  { %v51_v23 = vsel %vm50_vm1, %v49_v12, %v48_v19  ;;  %v76_v25 = vrot.slane %v563_v5, 6  ;;  %v78_v26 = vrot.slane %v570_v8, 5  ;;  %v80_v29 = vrot.slane %v575_v9, 4 }
   0x7   :  { %v54_v27 = vsel %vm53_vm2, %v52_v13, %v51_v23  ;;  %v73_v28 = vsel %vm47_vm0, %v553_v3, %v72_v21  ;;  %v82_v30 = vrot.slane %v580_v10, 3  ;;  %v84_v33 = vrot.slane %v588_v14, 2 }
   0x8   :  { %v57_v31 = vsel %vm56_vm3, %v55_v15, %v54_v27  ;;  %v75_v32 = vsel %vm50_vm1, %v74_v22, %v73_v28  ;;  %v91_v34 = vperm.slane %v538_v0, 2  ;;  %v93_v37 = vrot.slane %v548_v2, 2 }
   0x9   :  { %v60_v35 = vsel %vm59_vm4, %v58_v16, %v57_v31  ;;  %v77_v36 = vsel %vm53_vm2, %v76_v25, %v75_v32  ;;  %v94_v38 = vrot.slane %v553_v3, 1  ;;  %v97_v41 = vrot.slane %v563_v5, 7 }
   0xa   :  { %v63_v39 = vsel %vm62_vm5, %v61_v17, %v60_v35  ;;  %v79_v40 = vsel %vm56_vm3, %v78_v26, %v77_v36  ;;  %v99_v42 = vrot.slane %v570_v8, 6  ;;  %v101_v46 = vrot.slane %v575_v9, 5 }
   0xb   :  { %v66_v43 = vsel %vm65_vm6, %v64_v24, %v63_v39  ;;  %v81_v44 = vsel %vm59_vm4, %v80_v29, %v79_v40  ;;  %v95_v45 = vsel %vm47_vm0, %v94_v38, %v93_v37  ;;  %v103_v53 = vrot.slane %v580_v10, 4 }
   0xc   :  { %v68_v47 = vmul.f32 %v66_v43, %v36_v6  ;;  %v69_v48 = vmul.f32 %v66_v43, %v37_v7  ;;  %v83_v49 = vsel %vm62_vm5, %v82_v30, %v81_v44  ;;  %v96_v50 = vsel %vm50_vm1, %v558_v4, %v95_v45 }
   0xd   :  { %v85_v51 = vsel %vm65_vm6, %v84_v33, %v83_v49  ;;  %v98_v52 = vsel %vm53_vm2, %v97_v41, %v96_v50  ;;  %v105_v54 = vrot.slane %v588_v14, 3  ;;  %v92_v57 = vperm.slane %v543_v1, 2 }
   0xe   :  { %v87_v55 = vmul.f32 %v85_v51, %v70_v18  ;;  %v88_v56 = vmul.f32 %v85_v51, %v71_v20  ;;  %v100_v58 = vsel %vm56_vm3, %v99_v42, %v98_v52  ;;  %v112_v60 = vperm.slane %v538_v0, 3 }
   0xf   :  { %v102_v59 = vsel %vm59_vm4, %v101_v46, %v100_v58  ;;  %v114_v61 = vrot.slane %v548_v2, 3  ;;  %v115_v62 = vrot.slane %v553_v3, 2  ;;  %v117_v11 = vrot.slane %v558_v4, 1 }
  0x10   :  { %v89_v63 = vadd.f32 %v87_v55, %v68_v47  ;;  %v90_v6 = vadd.f32 %v88_v56, %v69_v48  ;;  %v104_v7 = vsel %vm62_vm5, %v103_v53, %v102_v59  ;;  %v120_v15 = vrot.slane %v570_v8, 7 }
  0x11   :  { %v106_v12 = vsel %vm65_vm6, %v105_v54, %v104_v7  ;;  %v116_v13 = vsel %vm47_vm0, %v115_v62, %v114_v61  ;;  %v122_v16 = vrot.slane %v575_v9, 6  ;;  %v124_v20 = vrot.slane %v580_v10, 5 }
  0x12   :  { %v108_v17 = vmul.f32 %v106_v12, %v91_v34  ;;  %v109_v18 = vmul.f32 %v106_v12, %v92_v57  ;;  %v118_v19 = vsel %vm50_vm1, %v117_v11, %v116_v13  ;;  %v113_v21 = vperm.slane %v543_v1, 3 }
  0x13   :  { %v119_v22 = vsel %vm53_vm2, %v563_v5, %v118_v19  ;;  %v126_v23 = vrot.slane %v588_v14, 4  ;;  %v133_v24 = vperm.slane %v538_v0, 4  ;;  %v134_v27 = vperm.slane %v543_v1, 4 }
  0x14   :  { %v110_v25 = vadd.f32 %v108_v17, %v89_v63  ;;  %v121_v26 = vsel %vm56_vm3, %v120_v15, %v119_v22  ;;  %v135_v28 = vrot.slane %v548_v2, 4  ;;  %v136_v30 = vrot.slane %v553_v3, 3 }
  0x15   :  { %v123_v29 = vsel %vm59_vm4, %v122_v16, %v121_v26  ;;  %v138_v31 = vrot.slane %v558_v4, 2  ;;  %v140_v32 = vrot.slane %v563_v5, 1  ;;  %v111_v33 = vadd.f32 %v109_v18, %v90_v6 }
  0x16   :  { %v125_v34 = vsel %vm62_vm5, %v124_v20, %v123_v29  ;;  %v143_v35 = vrot.slane %v575_v9, 7  ;;  %v145_v36 = vrot.slane %v580_v10, 6  ;;  %v137_v38 = vsel %vm47_vm0, %v136_v30, %v135_v28 }
  0x17   :  { %v127_v37 = vsel %vm65_vm6, %v126_v23, %v125_v34  ;;  %v147_v39 = vrot.slane %v588_v14, 5  ;;  %v154_v40 = vperm.slane %v538_v0, 5  ;;  %v139_v43 = vsel %vm50_vm1, %v138_v31, %v137_v38 }
  0x18   :  { %v129_v41 = vmul.f32 %v127_v37, %v112_v60  ;;  %v130_v42 = vmul.f32 %v127_v37, %v113_v21  ;;  %v156_v44 = vrot.slane %v548_v2, 5  ;;  %v141_v45 = vsel %vm53_vm2, %v140_v32, %v139_v43 }
  0x19   :  { %v157_v46 = vrot.slane %v553_v3, 4  ;;  %v159_v47 = vrot.slane %v558_v4, 3  ;;  %v161_v48 = vrot.slane %v563_v5, 2  ;;  %v142_v50 = vsel %vm56_vm3, %v570_v8, %v141_v45 }
  0x1a   :  { %v131_v49 = vadd.f32 %v129_v41, %v110_v25  ;;  %v155_v51 = vperm.slane %v543_v1, 5  ;;  %v163_v52 = vrot.slane %v570_v8, 1  ;;  %v132_v53 = vadd.f32 %v130_v42, %v111_v33 }
  0x1b   :  { %v144_v54 = vsel %vm59_vm4, %v143_v35, %v142_v50  ;;  %v158_v55 = vsel %vm47_vm0, %v157_v46, %v156_v44  ;;  %v166_v56 = vrot.slane %v580_v10, 7  ;;  %v168_v59 = vrot.slane %v588_v14, 6 }
  0x1c   :  { %v146_v57 = vsel %vm62_vm5, %v145_v36, %v144_v54  ;;  %v160_v58 = vsel %vm50_vm1, %v159_v47, %v158_v55  ;;  %v175_v60 = vperm.slane %v538_v0, 6  ;;  %v177_v63 = vrot.slane %v548_v2, 6 }
  0x1d   :  { %v148_v61 = vsel %vm65_vm6, %v147_v39, %v146_v57  ;;  %v162_v62 = vsel %vm53_vm2, %v161_v48, %v160_v58  ;;  %v178_v6 = vrot.slane %v553_v3, 5  ;;  %v180_v13 = vrot.slane %v558_v4, 4 }
  0x1e   :  { %v150_v7 = vmul.f32 %v148_v61, %v133_v24  ;;  %v151_v11 = vmul.f32 %v148_v61, %v134_v27  ;;  %v164_v12 = vsel %vm56_vm3, %v163_v52, %v162_v62  ;;  %v182_v17 = vrot.slane %v563_v5, 3 }
  0x1f   :  { %v165_v15 = vsel %vm59_vm4, %v575_v9, %v164_v12  ;;  %v179_v16 = vsel %vm47_vm0, %v178_v6, %v177_v63  ;;  %v184_v18 = vrot.slane %v570_v8, 2  ;;  %v186_v25 = vrot.slane %v575_v9, 1 }
  0x20   :  { %v152_v19 = vadd.f32 %v150_v7, %v131_v49  ;;  %v153_v20 = vadd.f32 %v151_v11, %v132_v53  ;;  %v167_v21 = vsel %vm62_vm5, %v166_v56, %v165_v15  ;;  %v181_v22 = vsel %vm50_vm1, %v180_v13, %v179_v16  ;;  %v734_v15 = vld [vmem:[%s920_s3] sm:$0xff] }
  0x21   :  { %v169_v23 = vsel %vm65_vm6, %v168_v59, %v167_v21  ;;  %v183_v24 = vsel %vm53_vm2, %v182_v17, %v181_v22  ;;  %v189_v26 = vrot.slane %v588_v14, 7  ;;  %v176_v29 = vperm.slane %v543_v1, 6 }
  0x22   :  { %v171_v27 = vmul.f32 %v169_v23, %v154_v40  ;;  %v172_v28 = vmul.f32 %v169_v23, %v155_v51  ;;  %v185_v30 = vsel %vm56_vm3, %v184_v18, %v183_v24  ;;  %v198_v32 = vrot.slane %v548_v2, 7  ;;  %v742_v23 = vld [vmem:[%s921_s2 + $0x8] sm:$0xff]  ;;  %v747_v24 = vld [vmem:[%s921_s2] sm:$0xff] }
  0x23   :  { %v187_v31 = vsel %vm59_vm4, %v186_v25, %v185_v30  ;;  %v199_v33 = vrot.slane %v553_v3, 6  ;;  %v201_v37 = vrot.slane %v558_v4, 5  ;;  %v203_v40 = vrot.slane %v563_v5, 4  ;;  %v752_v25 = vld [vmem:[%s921_s2 + $0x10] sm:$0xff] }
  0x24   :  { %v173_v34 = vadd.f32 %v171_v27, %v152_v19  ;;  %v174_v35 = vadd.f32 %v172_v28, %v153_v20  ;;  %v188_v36 = vsel %vm62_vm5, %v580_v10, %v187_v31  ;;  %v205_v41 = vrot.slane %v570_v8, 3  ;;  %v758_v27 = vld [vmem:[%s921_s2 + $0x18] sm:$0xff] }
  0x25   :  { %v190_v38 = vsel %vm65_vm6, %v189_v26, %v188_v36  ;;  %v200_v39 = vsel %vm47_vm0, %v199_v33, %v198_v32  ;;  %v207_v3 = vrot.slane %v575_v9, 2  ;;  %v209_v45 = vrot.slane %v580_v10, 1  ;;  %v769_v33 = vld [vmem:[%s921_s2 + $0x20] sm:$0xff] }
  0x26   :  { %v192_v42 = vmul.f32 %v190_v38, %v175_v60  ;;  %v193_v43 = vmul.f32 %v190_v38, %v176_v29  ;;  %v202_v2 = vsel %vm50_vm1, %v201_v37, %v200_v39  ;;  %v196_v4 = vperm.slane %v538_v0, 7  ;;  %v779_v39 = vld [vmem:[%s921_s2 + $0x28] sm:$0xff] }
  0x27   :  { %v204_v44 = vsel %vm53_vm2, %v203_v40, %v202_v2  ;;  %v197_v46 = vperm.slane %v543_v1, 7  ;;  %v505_v58 = vmov 0   ;;  %v507_v20 = vmov 1  }
  0x28   :  { %v206_v47 = vsel %vm56_vm3, %v205_v41, %v204_v44  ;;  %v194_v48 = vadd.f32 %v192_v42, %v173_v34  ;;  %v195_v8 = vadd.f32 %v193_v43, %v174_v35  ;;  %496 = vset.pattern.permute.xlu1 %v505_v58  ;;  %497 = vset.pattern.permute.xlu2 %v507_v20  ;;  %v273_v26 = vrot.slane %v742_v23, 7 }
  0x29   :  { %v208_v5 = vsel %vm59_vm4, %v207_v3, %v206_v47  ;;  %v275_v28 = vrot.slane %v752_v25, 6  ;;  %v292_v29 = vrot.slane %v747_v24, 1  ;;  %v277_v31 = vrot.slane %v758_v27, 5  ;;  %v796_v47 = vld [vmem:[%s921_s2 + $0x30] sm:$0xff] }
  0x2a   :  { %v210_v49 = vsel %vm62_vm5, %v209_v45, %v208_v5  ;;  %v274_v30 = vsel %vm47_vm0, %v273_v26, %v747_v24  ;;  %v294_v32 = vrot.slane %v752_v25, 7  ;;  %v296_v36 = vrot.slane %v758_v27, 6 }
  0x2b   :  { %v211_v50 = vsel %vm65_vm6, %v588_v14, %v210_v49  ;;  %v276_v34 = vsel %vm50_vm1, %v275_v28, %v274_v30  ;;  %v293_v35 = vsel %vm47_vm0, %v742_v23, %v292_v29  ;;  %v313_v37 = vrot.slane %v747_v24, 2  ;;  %v804_v49 = vld [vmem:[%s921_s2 + $0x38] sm:$0xff] }
  0x2c   :  { %v213_v9 = vmul.f32 %v211_v50, %v196_v4  ;;  %v214_v51 = vmul.f32 %v211_v50, %v197_v46  ;;  %v278_v40 = vsel %vm53_vm2, %v277_v31, %v276_v34  ;;  %v279_v41 = vrot.slane %v769_v33, 4 }
  0x2d   :  { %v295_v42 = vsel %vm50_vm1, %v294_v32, %v293_v35  ;;  %v314_v43 = vrot.slane %v742_v23, 1  ;;  %v334_v2 = vrot.slane %v747_v24, 3  ;;  %v335_v3 = vrot.slane %v742_v23, 2 }
  0x2e   :  { %v721_v52 = vadd.f32 %v213_v9, %v194_v48  ;;  %v723_v10 = vadd.f32 %v214_v51, %v195_v8  ;;  %v355_v44 = vrot.slane %v747_v24, 4  ;;  %v356_v45 = vrot.slane %v742_v23, 3 }
  0x2f   :  { %v298_v4 = vrot.slane %v769_v33, 5  ;;  %v281_v5 = vrot.slane %v779_v39, 3  ;;  %v297_v48 = vsel %vm53_vm2, %v296_v36, %v295_v42  ;;  %v300_v8 = vrot.slane %v779_v39, 4 }
  0x30   :  { %v217_v53 = vadd.f32 %v723_v10, %v721_v52  ;;  %v221_v54 = vmul.f32 %v721_v52, %v721_v52  ;;  %v222_v55 = vmul.f32 %v723_v10, %v723_v10  ;;  %v280_v50 = vsel %vm56_vm3, %v279_v41, %v278_v40 }
  0x31   :  { %v315_v9 = vsel %vm47_vm0, %v314_v43, %v313_v37  ;;  %v337_v51 = vrot.slane %v752_v25, 1  ;;  %v299_v58 = vsel %vm56_vm3, %v298_v4, %v297_v48  ;;  %v319_v20 = vrot.slane %v769_v33, 6 }
  0x32   :  { %218 = vadd.xlane.f32.xlu0 %v217_v53  ;;  %v223_v56 = vadd.f32 %v222_v55, %v221_v54  ;;  %v336_v53 = vsel %vm47_vm0, %v335_v3, %v334_v2  ;;  %v357_v54 = vsel %vm47_vm0, %v356_v45, %v355_v44  ;;  %v376_v55 = vrot.slane %v747_v24, 5 }
  0x33   :  { %v381_v29 = vrot.slane %v758_v27, 2  ;;  %v400_v31 = vrot.slane %v752_v25, 4  ;;  %v418_v32 = vrot.slane %v747_v24, 7  ;;  %v419_v34 = vrot.slane %v742_v23, 6 }
  0x34   :  { %v321_v36 = vrot.slane %v779_v39, 5  ;;  %v342_v37 = vrot.slane %v779_v39, 6  ;;  %v363_v42 = vrot.slane %v779_v39, 7  ;;  %v383_v43 = vrot.slane %v769_v33, 1 }
  0x35   :  { %v402_v2 = vrot.slane %v758_v27, 3  ;;  %v421_v3 = vrot.slane %v752_v25, 5  ;;  %v323_v44 = vrot.slane %v796_v47, 4  ;;  %v344_v45 = vrot.slane %v796_v47, 5 }
  0x3a   :  { %224 = vadd.xlane.f32.xlu0 %v223_v56  ;;  %v377_v56 = vrot.slane %v742_v23, 4 }
  0xa5   :  { %v219_v57 = vpop.xlane.xlu0 %218 }
  0xa6   :  { %v220_v14 = vmul.f32 0.020833334, %v219_v57 }
  0xa8   :  { %v227_v60 = vmul.f32 %v220_v14, %v220_v14 }
  0xad   :  { %v225_v59 = vpop.xlane.xlu0 %224 }
  0xae   :  { %v226_v61 = vmul.f32 0.020833334, %v225_v59  ;;  %v302_v59 = vrot.slane %v796_v47, 3 }
  0xb0   :  { %v228_v62 = vsub.f32 %v226_v61, %v227_v60  ;;  %v282_v60 = vsel %vm59_vm4, %v281_v5, %v280_v50  ;;  %v285_v61 = vrot.slane %v804_v49, 1  ;;  %v420_v5 = vsel %vm47_vm0, %v419_v34, %v418_v32 }
  0xb2   :  { %v229_v63 = vadd.f32 1e-05, %v228_v62  ;;  %v317_v62 = vrot.slane %v758_v27, 7 }
  0xb4   :  { %501 = vrsqrt.f32 %v229_v63  ;;  %vm236_vm8 = vweird.f32 %v229_v63 }
  0xba   :  { %v502_v6 = vpop.eup %501 }
  0xbb   :  { %v231_v7 = vmul.f32 %v502_v6, %v229_v63  ;;  %vm237_vm7 = vweird.f32 %v502_v6  ;;  %v360_v63 = vrot.slane %v758_v27, 1 }
  0xbc   :  { %vm238_vm9 = vmor %vm236_vm8, %vm237_vm7 }
  0xbd   :  { %v232_v11 = vmul.f32 %v502_v6, %v231_v7 }
  0xbf   :  { %v233_v12 = vmul.f32 0.5, %v232_v11  ;;  %v379_v11 = vrot.slane %v752_v25, 3 }
  0xc1   :  { %v234_v13 = vsub.f32 1.5, %v233_v12  ;;  %v301_v12 = vsel %vm59_vm4, %v300_v8, %v299_v58 }
  0xc2   :  { %v303_v35 = vsel %vm62_vm5, %v302_v59, %v301_v12 }
  0xc3   :  { %v235_v16 = vmul.f32 %v502_v6, %v234_v13  ;;  %v378_v13 = vsel %vm47_vm0, %v377_v56, %v376_v55  ;;  %v346_v55 = vrot.slane %v804_v49, 4 }
  0xc4   :  { %v380_v30 = vsel %vm50_vm1, %v379_v11, %v378_v13 }
  0xc5   :  { %v239_v17 = vsel %vm238_vm9, %v502_v6, %v235_v16  ;;  %v316_v6 = vsel %vm50_vm1, %v752_v25, %v315_v9  ;;  %v397_v16 = vrot.slane %v747_v24, 6  ;;  %v365_v9 = vrot.slane %v796_v47, 6 }
  0xc6   :  { %v240_v18 = vmul.f32 %v239_v17, %v734_v15  ;;  %v398_v17 = vrot.slane %v742_v23, 5  ;;  %v382_v23 = vsel %vm53_vm2, %v381_v29, %v380_v30 }
  0xc8   :  { %v241_v19 = vmul.f32 %v240_v18, %v220_v14  ;;  %v283_v14 = vrot.slane %v796_v47, 2 }
  0xca   :  { %243 = vrot.lane.b32.xlu1 %v241_v19, %s506_s9  ;;  %v304_v19 = vrot.slane %v804_v49, 2 }
  0xd2   :  { %249 = vperm.xlu1 %496, %v240_v18   ;;  %v284_v18 = vsel %vm62_vm5, %v283_v14, %v282_v60  ;;  %v422_v14 = vsel %vm50_vm1, %v421_v3, %v420_v5  ;;  %v367_v60 = vrot.slane %v804_v49, 5 }
  0xd3   :  { %v286_v48 = vsel %vm65_vm6, %v285_v61, %v284_v18  ;;  %v386_v61 = vrot.slane %v796_v47, 7 }
 0x13c   :  { %v244_v21 = vpop.permute.xlu1 %243 }
 0x13d   :  { %v246_v22 = vsub.f32 %v734_v15, %v244_v21  ;;  %v340_v21 = vrot.slane %v769_v33, 7 }
 0x13f   :  { %256 = vperm.xlu2 %497, %v246_v22   ;;  %v318_v22 = vsel %vm53_vm2, %v317_v62, %v316_v6  ;;  %v406_v6 = vrot.slane %v779_v39, 1 }
 0x140   :  { %v320_v40 = vsel %vm56_vm3, %v319_v20, %v318_v22  ;;  %v388_v20 = vrot.slane %v804_v49, 6 }
 0x141   :  { %v322_v8 = vsel %vm59_vm4, %v321_v36, %v320_v40 }
 0x142   :  { %v324_v58 = vsel %vm62_vm5, %v323_v44, %v322_v8 }
 0x144   :  { %v250_v38 = vpop.permute.xlu1 %249 }
 0x145   :  { %v791_v46 = vmul.f32 %v250_v38, %v721_v52  ;;  %v358_v52 = vrot.slane %v752_v25, 2  ;;  %v815_v57 = vmul.f32 %v250_v38, %v723_v10  ;;  %v338_v10 = vsel %vm50_vm1, %v337_v51, %v336_v53 }
 0x146   :  { %v339_v26 = vsel %vm53_vm2, %v758_v27, %v338_v10  ;;  %v399_v38 = vsel %vm47_vm0, %v398_v17, %v397_v16  ;;  %v384_v25 = vsel %vm56_vm3, %v383_v43, %v382_v23  ;;  %v423_v53 = vrot.slane %v758_v27, 4 }
 0x147   :  { %v359_v7 = vsel %vm50_vm1, %v358_v52, %v357_v54  ;;  %v341_v41 = vsel %vm56_vm3, %v340_v21, %v339_v26  ;;  %v401_v4 = vsel %vm50_vm1, %v400_v31, %v399_v38  ;;  %v404_v52 = vrot.slane %v769_v33, 2 }
 0x148   :  { %v361_v28 = vsel %vm53_vm2, %v360_v63, %v359_v7  ;;  %v343_v50 = vsel %vm59_vm4, %v342_v37, %v341_v41  ;;  %v325_v54 = vrot.slane %v804_v49, 3  ;;  %v403_v56 = vsel %vm53_vm2, %v402_v2, %v401_v4 }
 0x149   :  { %v362_v24 = vsel %vm56_vm3, %v769_v33, %v361_v28  ;;  %v345_v59 = vsel %vm62_vm5, %v344_v45, %v343_v50  ;;  %v385_v27 = vsel %vm59_vm4, %v779_v39, %v384_v25  ;;  %v425_v10 = vrot.slane %v769_v33, 3 }
 0x14a   :  { %v364_v51 = vsel %vm59_vm4, %v363_v42, %v362_v24  ;;  %v405_v12 = vsel %vm56_vm3, %v404_v52, %v403_v56  ;;  %v424_v13 = vsel %vm53_vm2, %v423_v53, %v422_v14  ;;  %v305_v16 = vsel %vm65_vm6, %v304_v19, %v303_v35 }
 0x14b   :  { %v366_v63 = vsel %vm62_vm5, %v365_v9, %v364_v51  ;;  %v326_v17 = vsel %vm65_vm6, %v325_v54, %v324_v58  ;;  %v347_v18 = vsel %vm65_vm6, %v346_v55, %v345_v59  ;;  %v407_v26 = vsel %vm59_vm4, %v406_v6, %v405_v12 }
 0x14c   :  { %v368_v33 = vsel %vm65_vm6, %v367_v60, %v366_v63  ;;  %v426_v28 = vsel %vm56_vm3, %v425_v10, %v424_v13  ;;  %v427_v19 = vrot.slane %v779_v39, 2  ;;  %v429_v2 = vrot.slane %v796_v47, 1 }
 0x14d   :  { %v408_v50 = vsel %vm62_vm5, %v796_v47, %v407_v26 }
 0x14e   :  { %v428_v23 = vsel %vm59_vm4, %v427_v19, %v426_v28 }
 0x14f   :  { %v430_v54 = vsel %vm62_vm5, %v429_v2, %v428_v23 }
 0x150   :  { %v431_v6 = vsel %vm65_vm6, %v804_v49, %v430_v54 }
 0x199   :  { %v257_v62 = vpop.permute.xlu2 %256 }
 0x19a   :  { %v259_v7 = vadd.f32 %v257_v62, %v791_v46  ;;  %v260_v11 = vadd.f32 %v257_v62, %v815_v57  ;;  %v409_v46 = vrot.slane %v804_v49, 7  ;;  %v387_v57 = vsel %vm62_vm5, %v386_v61, %v385_v27 }
 0x19b   :  { %v389_v8 = vsel %vm65_vm6, %v388_v20, %v387_v57 }
 0x19c   :  { %v261_v21 = vmax.f32 %v259_v7, 0.0  ;;  %v262_v22 = vmax.f32 %v260_v11, 0.0  ;;  %v410_v61 = vsel %vm65_vm6, %v409_v46, %v408_v50 }
 0x19e   :  { %v263_v29 = vperm.slane %v261_v21, 0  ;;  %v264_v30 = vperm.slane %v262_v22, 0  ;;  %v290_v31 = vperm.slane %v261_v21, 1  ;;  %v291_v32 = vperm.slane %v262_v22, 1 }
 0x19f   :  { %v311_v34 = vperm.slane %v261_v21, 2  ;;  %v312_v35 = vperm.slane %v262_v22, 2  ;;  %v332_v36 = vperm.slane %v261_v21, 3  ;;  %v333_v37 = vperm.slane %v262_v22, 3 }
 0x1a0   :  { %v288_v38 = vmul.f32 %v286_v48, %v263_v29  ;;  %v289_v40 = vmul.f32 %v286_v48, %v264_v30  ;;  %v307_v41 = vmul.f32 %v305_v16, %v290_v31  ;;  %v308_v42 = vmul.f32 %v305_v16, %v291_v32 }
 0x1a1   :  { %v328_v43 = vmul.f32 %v326_v17, %v311_v34  ;;  %v329_v24 = vmul.f32 %v326_v17, %v312_v35  ;;  %v353_v44 = vperm.slane %v261_v21, 4  ;;  %v354_v45 = vperm.slane %v262_v22, 4 }
 0x1a2   :  { %v309_v3 = vadd.f32 %v307_v41, %v288_v38  ;;  %v310_v39 = vadd.f32 %v308_v42, %v289_v40  ;;  %v374_v4 = vperm.slane %v261_v21, 5  ;;  %v375_v5 = vperm.slane %v262_v22, 5 }
 0x1a3   :  { %v349_v51 = vmul.f32 %v347_v18, %v332_v36  ;;  %v350_v25 = vmul.f32 %v347_v18, %v333_v37  ;;  %v395_v52 = vperm.slane %v261_v21, 6  ;;  %v396_v53 = vperm.slane %v262_v22, 6 }
 0x1a4   :  { %v330_v48 = vadd.f32 %v328_v43, %v309_v3  ;;  %v331_v9 = vadd.f32 %v329_v24, %v310_v39  ;;  %v370_v14 = vmul.f32 %v368_v33, %v353_v44  ;;  %v371_v58 = vmul.f32 %v368_v33, %v354_v45 }
 0x1a5   :  { %v391_v59 = vmul.f32 %v389_v8, %v374_v4  ;;  %v392_v60 = vmul.f32 %v389_v8, %v375_v5  ;;  %v416_v27 = vperm.slane %v261_v21, 7  ;;  %v417_v47 = vperm.slane %v262_v22, 7 }
 0x1a6   :  { %v351_v55 = vadd.f32 %v349_v51, %v330_v48  ;;  %v352_v56 = vadd.f32 %v350_v25, %v331_v9  ;;  %v412_v11 = vmul.f32 %v410_v61, %v395_v52  ;;  %v413_v12 = vmul.f32 %v410_v61, %v396_v53 }
 0x1a7   :  { %v433_v17 = vmul.f32 %v431_v6, %v416_v27  ;;  %v434_v18 = vmul.f32 %v431_v6, %v417_v47  ;;  %v508_v21 = vmov 2   ;;  %v509_v24 = vmov 3  }
 0x1a8   :  { %v372_v62 = vadd.f32 %v370_v14, %v351_v55  ;;  %v373_v63 = vadd.f32 %v371_v58, %v352_v56  ;;  %498 = vset.pattern.permute.xlu0 %v508_v21  ;;  %499 = vset.pattern.permute.xlu1 %v509_v24 }
 0x1aa   :  { %v393_v10 = vadd.f32 %v391_v59, %v372_v62  ;;  %v394_v7 = vadd.f32 %v392_v60, %v373_v63 }
 0x1ac   :  { %v414_v13 = vadd.f32 %v412_v11, %v393_v10  ;;  %v415_v16 = vadd.f32 %v413_v12, %v394_v7 }
 0x1ae   :  { %v435_v20 = vadd.f32 %v433_v17, %v414_v13  ;;  %v436_v33 = vadd.f32 %v434_v18, %v415_v16 }
 0x1b0   :  { %v437_v57 = vadd.f32 %v436_v33, %v435_v20  ;;  %v441_v26 = vmul.f32 %v435_v20, %v435_v20  ;;  %v442_v46 = vmul.f32 %v436_v33, %v436_v33 }
 0x1b2   :  { %438 = vadd.xlane.f32.xlu2 %v437_v57  ;;  %v443_v28 = vadd.f32 %v442_v46, %v441_v26 }
 0x1b4   :  { %444 = vadd.xlane.f32.xlu0 %v443_v28 }
 0x225   :  { %v439_v22 = vpop.xlane.xlu2 %438 }
 0x226   :  { %v440_v49 = vmul.f32 0.020833334, %v439_v22 }
 0x227   :  { %v445_v19 = vpop.xlane.xlu0 %444 }
 0x228   :  { %v447_v29 = vmul.f32 %v440_v49, %v440_v49  ;;  %v446_v30 = vmul.f32 0.020833334, %v445_v19 }
 0x22a   :  { %v448_v31 = vsub.f32 %v446_v30, %v447_v29 }
 0x22c   :  { %v449_v32 = vadd.f32 1e-05, %v448_v31 }
 0x22e   :  { %503 = vrsqrt.f32 %v449_v32  ;;  %vm456_vm11 = vweird.f32 %v449_v32 }
 0x234   :  { %v504_v34 = vpop.eup %503 }
 0x235   :  { %v451_v35 = vmul.f32 %v504_v34, %v449_v32  ;;  %vm457_vm10 = vweird.f32 %v504_v34 }
 0x236   :  { %vm458_vm12 = vmor %vm456_vm11, %vm457_vm10 }
 0x237   :  { %v452_v36 = vmul.f32 %v504_v34, %v451_v35 }
 0x239   :  { %v453_v37 = vmul.f32 0.5, %v452_v36 }
 0x23b   :  { %v454_v38 = vsub.f32 1.5, %v453_v37 }
 0x23d   :  { %v455_v40 = vmul.f32 %v504_v34, %v454_v38 }
 0x23f   :  { %v459_v41 = vsel %vm458_vm12, %v504_v34, %v455_v40 }
 0x240   :  { %v460_v42 = vmul.f32 %v459_v41, %v734_v15 }
 0x242   :  { %469 = vperm.xlu0 %498, %v460_v42   ;;  %v461_v43 = vmul.f32 %v460_v42, %v440_v49 }
 0x244   :  { %463 = vrot.lane.b32.xlu1 %v461_v43, %s506_s9 }
 0x24a   :  { %500 = vset.pattern.permute.xlu0 %v509_v24 }
 0x2b4   :  { %v470_v3 = vpop.permute.xlu0 %469 }
 0x2b5   :  { %v472_v39 = vmul.f32 %v470_v3, %v435_v20  ;;  %v473_v44 = vmul.f32 %v470_v3, %v436_v33 }
 0x2b6   :  { %v464_v23 = vpop.permute.xlu1 %463 }
 0x2b7   :  { %v466_v2 = vsub.f32 %v734_v15, %v464_v23 }
 0x2b9   :  { %476 = vperm.xlu1 %499, %v466_v2  }
 0x32b   :  { %v477_v45 = vpop.permute.xlu1 %476 }
 0x32c   :  { %v479_v4 = vadd.f32 %v477_v45, %v472_v39  ;;  %v480_v5 = vadd.f32 %v477_v45, %v473_v44 }
 0x32e   :  { %v481_v8 = vadd.f32 %v479_v4, %v538_v0  ;;  %v482_v50 = vadd.f32 %v480_v5, %v543_v1 }
 0x330   :  { %v483_v48 = vmax.f32 %v481_v8, 0.0  ;;  %v484_v9 = vmax.f32 %v482_v50, 0.0 }
 0x332   :  { %485 = vst [vmem:[%s922_s4] sm:$0xff] %v483_v48 }
 0x333   :  { %486 = vst [vmem:[%s922_s4 + $0x8] sm:$0xff] %v484_v9 }

</bundles_post_ra>
